<compile_context>
chip_gen: v6e
topology: v6e:2x2x1
jax: 0.10.0
libtpu: 0.0.40
codegen_flags: <defaults>
</compile_context>

<pallas_src>
import functools
import math

import jax
import jax.numpy as jnp
from jax import lax
from jax.experimental import pallas as pl
from jax.experimental.pallas import tpu as pltpu


# --------------------------------------------------------------------------
# Kernel body: one grid step = one batch element, all heads.
# --------------------------------------------------------------------------
def _attention_body(x_ref, wqkv_ref, bqkv_ref, wo_ref, bo_ref,
                    out_ref, probs_ref, *, num_heads, head_size, seq_len):
    """Per-batch attention.

    x_ref    : (1, S_pad, H)        bf16 activations
    wqkv_ref : (H, 3H)              bf16 fused [Wq*s | Wk | Wv]   (grid-invariant)
    bqkv_ref : (1, 3H)              f32  fused [bq*s | bk | bv]   (grid-invariant)
    wo_ref   : (H, H)               bf16 output projection        (grid-invariant)
    bo_ref   : (1, H)               f32  output projection bias   (grid-invariant)
    out_ref  : (1, S_pad, H)        output block
    probs_ref: (1, nh, S_pad, S_pad) attention probabilities, or None (vis=False)
    """
    H = num_heads * head_size
    x = x_ref[0]                                                  # (S_pad, H) bf16
    s_pad = x.shape[0]

    # Fused QKV projection: one MXU pass with a full H-deep contraction.
    # 1/sqrt(head_size) is already baked into the Wq/bq columns.
    qkv = jnp.dot(x, wqkv_ref[...], preferred_element_type=jnp.float32)
    qkv = (qkv + bqkv_ref[...]).astype(jnp.bfloat16)              # (S_pad, 3H)

    need_mask = seq_len < s_pad
    if need_mask:
        key_ids = lax.broadcasted_iota(jnp.int32, (s_pad, s_pad), 1)
        key_valid = key_ids < seq_len

    ctx_pieces = []
    # Heads are a small static loop (num_heads known at trace time).
    for h in range(num_heads):
        lo = h * head_size
        hi = lo + head_size
        qh = qkv[:, lo:hi]                                        # (S_pad, dh)
        kh = qkv[:, H + lo:H + hi]
        vh = qkv[:, 2 * H + lo:2 * H + hi]

        # scores = (q*scale) @ k.T without materializing a transpose.
        scores = lax.dot_general(
            qh, kh, (((1,), (1,)), ((), ())),
            preferred_element_type=jnp.float32)                   # (S_pad, S_pad) f32
        if need_mask:
            scores = jnp.where(key_valid, scores, -1e30)

        # Softmax in f32; the divide goes to the EUP and is fused with the
        # bf16 cast so only one f32 (S,S) tile stays live.
        m = jnp.max(scores, axis=-1, keepdims=True)
        e = jnp.exp(scores - m)
        denom = jnp.sum(e, axis=-1, keepdims=True)
        p = (e * pl.reciprocal(denom, approx=True)).astype(jnp.bfloat16)

        if probs_ref is not None:
            probs_ref[0, h] = p.astype(probs_ref.dtype)
        # attn_dropout: identity (eval mode)

        ctx_pieces.append(
            jnp.dot(p, vh, preferred_element_type=jnp.float32)
            .astype(jnp.bfloat16))                                # (S_pad, dh)

    ctx = ctx_pieces[0] if num_heads == 1 else jnp.concatenate(ctx_pieces, axis=-1)

    # Output projection: single (S,H) x (H,H) dot, full-depth contraction.
    out = jnp.dot(ctx, wo_ref[...], preferred_element_type=jnp.float32)
    out = out + bo_ref[...]
    # proj_dropout: identity (eval mode)
    out_ref[0] = out.astype(out_ref.dtype)


def _kernel_vis(x_ref, wqkv_ref, bqkv_ref, wo_ref, bo_ref,
                out_ref, probs_ref, **kw):
    _attention_body(x_ref, wqkv_ref, bqkv_ref, wo_ref, bo_ref,
                    out_ref, probs_ref, **kw)


def _kernel_novis(x_ref, wqkv_ref, bqkv_ref, wo_ref, bo_ref,
                  out_ref, **kw):
    _attention_body(x_ref, wqkv_ref, bqkv_ref, wo_ref, bo_ref,
                    out_ref, None, **kw)


# --------------------------------------------------------------------------
# One-time (cacheable) weight fusion -- hoisted out of the forward path.
# --------------------------------------------------------------------------
def fuse_attention_params(params, *, num_heads, compute_dtype=jnp.bfloat16):
    wq, bq = params["wq"], params["bq"]
    wk, bk = params["wk"], params["bk"]
    wv, bv = params["wv"], params["bv"]
    wo, bo = params["wo"], params["bo"]
    H = wq.shape[0]
    assert H % num_heads == 0
    dh = H // num_heads
    inv_scale = 1.0 / math.sqrt(dh)

    # Fold the softmax scale into the query projection (free at run time).
    wqkv = jnp.concatenate(
        [wq * inv_scale, wk, wv], axis=-1).astype(compute_dtype)      # (H, 3H)
    bqkv = jnp.concatenate(
        [bq * inv_scale, bk, bv], axis=0).reshape(1, 3 * H).astype(jnp.float32)
    return {
        "wqkv": wqkv,
        "bqkv": bqkv,
        "wo": wo.astype(compute_dtype),                                # (H, H)
        "bo": bo.reshape(1, H).astype(jnp.float32),                    # (1, H)
        "num_heads": num_heads,
        "head_size": dh,
    }


# --------------------------------------------------------------------------
# Forward wrapper.
# --------------------------------------------------------------------------
def vit_attention(hidden_states, fused, *, vis=True,
                  probs_dtype=jnp.bfloat16):
    B, S, H = hidden_states.shape
    num_heads = fused["num_heads"]
    dh = fused["head_size"]
    assert num_heads * dh == H

    # Pad S to a sublane-friendly multiple (lane-dense 128 for long seqs,
    # e.g. ViT's S=197 -> 256).  Padded key columns are masked in-kernel.
    pad_to = 128 if S >= 128 else 8
    S_pad = pl.cdiv(S, pad_to) * pad_to

    x = hidden_states.astype(jnp.bfloat16)
    if S_pad != S:
        x = jnp.pad(x, ((0, 0), (0, S_pad - S), (0, 0)))

    wqkv, bqkv, wo, bo = fused["wqkv"], fused["bqkv"], fused["wo"], fused["bo"]

    flops = 8 * B * S_pad * H * H + 4 * B * num_heads * S_pad * S_pad * dh
    bytes_accessed = int(
        x.size * 2 + wqkv.size * 2 + wo.size * 2 + bqkv.size * 4 + bo.size * 4
        + B * S_pad * H * jnp.dtype(hidden_states.dtype).itemsize
        + (B * num_heads * S_pad * S_pad * jnp.dtype(probs_dtype).itemsize
           if vis else 0))
    cost = pl.CostEstimate(flops=flops,
                           transcendentals=B * num_heads * S_pad * S_pad,
                           bytes_accessed=bytes_accessed)

    # Weight specs return the same block index for every grid step, so the
    # fused weights stay VMEM-resident instead of being re-DMA'd per batch.
    in_specs = [
        pl.BlockSpec((1, S_pad, H), lambda b: (b, 0, 0)),          # x
        pl.BlockSpec((H, 3 * H), lambda b: (0, 0)),                # fused Wqkv
        pl.BlockSpec((1, 3 * H), lambda b: (0, 0)),                # fused bqkv
        pl.BlockSpec((H, H), lambda b: (0, 0)),                    # Wo
        pl.BlockSpec((1, H), lambda b: (0, 0)),                    # bo
    ]
    out_spec_o = pl.BlockSpec((1, S_pad, H), lambda b: (b, 0, 0))
    cparams = pltpu.CompilerParams(dimension_semantics=("parallel",))
    body_kw = dict(num_heads=num_heads, head_size=dh, seq_len=S)

    if vis:
        out, probs = pl.pallas_call(
            functools.partial(_kernel_vis, **body_kw),
            out_shape=(
                jax.ShapeDtypeStruct((B, S_pad, H), hidden_states.dtype),
                jax.ShapeDtypeStruct((B, num_heads, S_pad, S_pad), probs_dtype),
            ),
            grid_spec=pltpu.PrefetchScalarGridSpec(
                num_scalar_prefetch=0,
                grid=(B,),
                in_specs=in_specs,
                out_specs=[
                    out_spec_o,
                    pl.BlockSpec((1, num_heads, S_pad, S_pad),
                                 lambda b: (b, 0, 0, 0)),
                ]),
            compiler_params=cparams,
            cost_estimate=cost,
        )(x, wqkv, bqkv, wo, bo)
        if S_pad != S:
            out = out[:, :S, :]
            probs = probs[:, :, :S, :S]
        return out, probs

    out = pl.pallas_call(
        functools.partial(_kernel_novis, **body_kw),
        out_shape=jax.ShapeDtypeStruct((B, S_pad, H), hidden_states.dtype),
        grid_spec=pltpu.PrefetchScalarGridSpec(
            num_scalar_prefetch=0,
            grid=(B,),
            in_specs=in_specs,
            out_specs=out_spec_o),
        compiler_params=cparams,
        cost_estimate=cost,
    )(x, wqkv, bqkv, wo, bo)
    if S_pad != S:
        out = out[:, :S, :]
    return out, None


# --------------------------------------------------------------------------
# Pure-JAX f32 reference mirroring the PyTorch forward (eval mode).
# --------------------------------------------------------------------------
def reference_attention(x, params, *, num_heads):
    B, S, H = x.shape
    dh = H // num_heads

    def lin(t, w, b):
        return t @ w + b

    def split_heads(t):  # (B, S, H) -> (B, nh, S, dh)
        return t.reshape(B, S, num_heads, dh).transpose(0, 2, 1, 3)

    q = split_heads(lin(x, params["wq"], params["bq"]))
    k = split_heads(lin(x, params["wk"], params["bk"]))
    v = split_heads(lin(x, params["wv"], params["bv"]))

    scores = jnp.einsum("bhqd,bhkd->bhqk", q, k) / math.sqrt(dh)
    probs = jax.nn.softmax(scores, axis=-1)
    ctx = jnp.einsum("bhqk,bhkd->bhqd", probs, v)
    ctx = ctx.transpose(0, 2, 1, 3).reshape(B, S, H)
    out = lin(ctx, params["wo"], params["bo"])
    return out, probs


if __name__ == "__main__":
    # Small config consistent with the module: hidden_size=32, num_heads=4
    B, S, H = 2, 8, 32
    NUM_HEADS = 4

    key = jax.random.PRNGKey(0)
    keys = jax.random.split(key, 9)

    scale = 0.02
    params = {
        "wq": scale * jax.random.normal(keys[0], (H, H), jnp.float32),
        "bq": scale * jax.random.normal(keys[1], (H,), jnp.float32),
        "wk": scale * jax.random.normal(keys[2], (H, H), jnp.float32),
        "bk": scale * jax.random.normal(keys[3], (H,), jnp.float32),
        "wv": scale * jax.random.normal(keys[4], (H, H), jnp.float32),
        "bv": scale * jax.random.normal(keys[5], (H,), jnp.float32),
        "wo": scale * jax.random.normal(keys[6], (H, H), jnp.float32),
        "bo": scale * jax.random.normal(keys[7], (H,), jnp.float32),
    }
    hidden_states = jax.random.normal(keys[8], (B, S, H), jnp.float32)

    # One-time weight fusion (cache and reuse across forward calls).
    fused = fuse_attention_params(params, num_heads=NUM_HEADS)
    jax.block_until_ready(fused["wqkv"])

    # vis=True path (returns attention probabilities, like PyTorch vis=True)
    out, weights = vit_attention(hidden_states, fused, vis=True)
    jax.block_until_ready(out)
    jax.block_until_ready(weights)

    # vis=False fast path (no probs writeback)
    out_fast, none_w = vit_attention(hidden_states, fused, vis=False)
    jax.block_until_ready(out_fast)
    assert none_w is None

    # correctness check against pure-JAX f32 reference
    # (tolerances loosened: matmuls run in bf16 on the MXU, probs are bf16)
    ref_out, ref_w = reference_attention(hidden_states, params,
                                         num_heads=NUM_HEADS)
    assert jnp.allclose(out, ref_out, atol=1e-2, rtol=1e-2), "output mismatch"
    assert jnp.allclose(weights.astype(jnp.float32), ref_w,
                        atol=1e-2, rtol=1e-2), "weights mismatch"
    assert jnp.allclose(out_fast, ref_out, atol=1e-2, rtol=1e-2), \
        "vis=False output mismatch"

    # Also exercise the padded / key-masked path (awkward S -> sublane pad).
    S2 = 10
    hs2 = jax.random.normal(jax.random.PRNGKey(1), (B, S2, H), jnp.float32)
    out2, w2 = vit_attention(hs2, fused, vis=True)
    jax.block_until_ready(out2)
    ref_out2, ref_w2 = reference_attention(hs2, params, num_heads=NUM_HEADS)
    assert out2.shape == (B, S2, H) and w2.shape == (B, NUM_HEADS, S2, S2)
    assert jnp.allclose(out2, ref_out2, atol=1e-2, rtol=1e-2), \
        "padded output mismatch"
    assert jnp.allclose(w2.astype(jnp.float32), ref_w2,
                        atol=1e-2, rtol=1e-2), "padded weights mismatch"

    print("KERNEL_OK")
</pallas_src>

<mosaic_0001>
module attributes {stable_mosaic.version = 11 : i64} {
  func.func @_kernel_vis(%arg0: i32, %arg1: memref<1x8x32xbf16, #tpu.memory_space<vmem>>, %arg2: memref<32x96xbf16, #tpu.memory_space<vmem>>, %arg3: memref<1x96xf32, #tpu.memory_space<vmem>>, %arg4: memref<32x32xbf16, #tpu.memory_space<vmem>>, %arg5: memref<1x32xf32, #tpu.memory_space<vmem>>, %arg6: memref<1x8x32xf32, #tpu.memory_space<vmem>>, %arg7: memref<1x4x8x8xbf16, #tpu.memory_space<vmem>>) attributes {dimension_semantics = [#tpu.dimension_semantics<parallel>], iteration_bounds = array<i64: 2>, scalar_prefetch = 0 : i64, scratch_operands = 0 : i64, tpu.core_type = #tpu.core_type<tc>, window_params = [{transform_indices = @transform_0, window_bounds = array<i64: 1, 8, 32>}, {pipeline_mode = #tpu.pipeline_mode<synchronous>, transform_indices = @transform_1, window_bounds = array<i64: 32, 96>}, {pipeline_mode = #tpu.pipeline_mode<synchronous>, transform_indices = @transform_2, window_bounds = array<i64: 1, 96>}, {pipeline_mode = #tpu.pipeline_mode<synchronous>, transform_indices = @transform_3, window_bounds = array<i64: 32, 32>}, {pipeline_mode = #tpu.pipeline_mode<synchronous>, transform_indices = @transform_4, window_bounds = array<i64: 1, 32>}, {transform_indices = @transform_5, window_bounds = array<i64: 1, 8, 32>}, {transform_indices = @transform_6, window_bounds = array<i64: 1, 4, 8, 8>}]} {
    %c0 = arith.constant 0 : index
    %c0_0 = arith.constant 0 : index
    %c0_1 = arith.constant 0 : index
    %0 = vector.load %arg1[%c0, %c0_0, %c0_1] : memref<1x8x32xbf16, #tpu.memory_space<vmem>>, vector<1x8x32xbf16>
    %1 = vector.shape_cast %0 : vector<1x8x32xbf16> to vector<8x32xbf16>
    %c0_2 = arith.constant 0 : index
    %c0_3 = arith.constant 0 : index
    %2 = vector.load %arg2[%c0_2, %c0_3] : memref<32x96xbf16, #tpu.memory_space<vmem>>, vector<32x96xbf16>
    %cst = arith.constant dense<0.000000e+00> : vector<8x96xf32>
    %3 = tpu.matmul %1, %2, %cst {dimension_numbers = #tpu.dot_dimension_numbers<[1], [0], [0], [1], [0, 0, 1, 1], [], []>} : vector<8x32xbf16>, vector<32x96xbf16>, vector<8x96xf32> -> vector<8x96xf32>
    %c0_4 = arith.constant 0 : index
    %c0_5 = arith.constant 0 : index
    %4 = vector.load %arg3[%c0_4, %c0_5] : memref<1x96xf32, #tpu.memory_space<vmem>>, vector<1x96xf32>
    %5 = vector.broadcast %4 : vector<1x96xf32> to vector<8x96xf32>
    %6 = arith.addf %3, %5 : vector<8x96xf32>
    %7 = arith.truncf %6 : vector<8x96xf32> to vector<8x96xbf16>
    %8 = vector.extract_strided_slice %7 {offsets = [0, 0], sizes = [8, 8], strides = [1, 1]} : vector<8x96xbf16> to vector<8x8xbf16>
    %9 = vector.extract_strided_slice %7 {offsets = [0, 32], sizes = [8, 8], strides = [1, 1]} : vector<8x96xbf16> to vector<8x8xbf16>
    %10 = vector.extract_strided_slice %7 {offsets = [0, 64], sizes = [8, 8], strides = [1, 1]} : vector<8x96xbf16> to vector<8x8xbf16>
    %cst_6 = arith.constant dense<0.000000e+00> : vector<8x8xf32>
    %11 = tpu.matmul %8, %9, %cst_6 {dimension_numbers = #tpu.dot_dimension_numbers<[1], [1], [0], [0], [0, 0, 1, 0], [], []>} : vector<8x8xbf16>, vector<8x8xbf16>, vector<8x8xf32> -> vector<8x8xf32>
    %cst_7 = arith.constant dense<0xFF800000> : vector<8xf32>
    %12 = vector.multi_reduction <maximumf>, %11, %cst_7 [1] : vector<8x8xf32> to vector<8xf32>
    %13 = vector.shape_cast %12 : vector<8xf32> to vector<8x1xf32>
    %14 = vector.broadcast %13 : vector<8x1xf32> to vector<8x8xf32>
    %15 = arith.subf %11, %14 : vector<8x8xf32>
    %16 = math.exp %15 : vector<8x8xf32>
    %cst_8 = arith.constant dense<0.000000e+00> : vector<8xf32>
    %17 = vector.multi_reduction <add>, %16, %cst_8 [1] : vector<8x8xf32> to vector<8xf32>
    %18 = vector.shape_cast %17 : vector<8xf32> to vector<8x1xf32>
    %19 = tpu.reciprocal %18 {approx = true} : vector<8x1xf32> -> vector<8x1xf32>
    %20 = vector.broadcast %19 : vector<8x1xf32> to vector<8x8xf32>
    %21 = arith.mulf %16, %20 : vector<8x8xf32>
    %22 = arith.truncf %21 : vector<8x8xf32> to vector<8x8xbf16>
    %c0_9 = arith.constant 0 : index
    %c0_10 = arith.constant 0 : index
    %c0_11 = arith.constant 0 : index
    %c0_12 = arith.constant 0 : index
    %23 = vector.load %arg7[%c0_9, %c0_10, %c0_11, %c0_12] : memref<1x4x8x8xbf16, #tpu.memory_space<vmem>>, vector<1x1x8x8xbf16>
    %24 = vector.shape_cast %23 : vector<1x1x8x8xbf16> to vector<8x8xbf16>
    %25 = vector.shape_cast %22 : vector<8x8xbf16> to vector<1x1x8x8xbf16>
    tpu.vector_store %arg7[%c0_9, %c0_10, %c0_11, %c0_12], %25 {strides = array<i32>} : memref<1x4x8x8xbf16, #tpu.memory_space<vmem>>, vector<1x1x8x8xbf16>,
    %cst_13 = arith.constant dense<0.000000e+00> : vector<8x8xf32>
    %26 = tpu.matmul %22, %10, %cst_13 {dimension_numbers = #tpu.dot_dimension_numbers<[1], [0], [0], [1], [0, 0, 1, 1], [], []>} : vector<8x8xbf16>, vector<8x8xbf16>, vector<8x8xf32> -> vector<8x8xf32>
    %27 = arith.truncf %26 : vector<8x8xf32> to vector<8x8xbf16>
    %28 = vector.extract_strided_slice %7 {offsets = [0, 8], sizes = [8, 8], strides = [1, 1]} : vector<8x96xbf16> to vector<8x8xbf16>
    %29 = vector.extract_strided_slice %7 {offsets = [0, 40], sizes = [8, 8], strides = [1, 1]} : vector<8x96xbf16> to vector<8x8xbf16>
    %30 = vector.extract_strided_slice %7 {offsets = [0, 72], sizes = [8, 8], strides = [1, 1]} : vector<8x96xbf16> to vector<8x8xbf16>
    %cst_14 = arith.constant dense<0.000000e+00> : vector<8x8xf32>
    %31 = tpu.matmul %28, %29, %cst_14 {dimension_numbers = #tpu.dot_dimension_numbers<[1], [1], [0], [0], [0, 0, 1, 0], [], []>} : vector<8x8xbf16>, vector<8x8xbf16>, vector<8x8xf32> -> vector<8x8xf32>
    %cst_15 = arith.constant dense<0xFF800000> : vector<8xf32>
    %32 = vector.multi_reduction <maximumf>, %31, %cst_15 [1] : vector<8x8xf32> to vector<8xf32>
    %33 = vector.shape_cast %32 : vector<8xf32> to vector<8x1xf32>
    %34 = vector.broadcast %33 : vector<8x1xf32> to vector<8x8xf32>
    %35 = arith.subf %31, %34 : vector<8x8xf32>
    %36 = math.exp %35 : vector<8x8xf32>
    %cst_16 = arith.constant dense<0.000000e+00> : vector<8xf32>
    %37 = vector.multi_reduction <add>, %36, %cst_16 [1] : vector<8x8xf32> to vector<8xf32>
    %38 = vector.shape_cast %37 : vector<8xf32> to vector<8x1xf32>
    %39 = tpu.reciprocal %38 {approx = true} : vector<8x1xf32> -> vector<8x1xf32>
    %40 = vector.broadcast %39 : vector<8x1xf32> to vector<8x8xf32>
    %41 = arith.mulf %36, %40 : vector<8x8xf32>
    %42 = arith.truncf %41 : vector<8x8xf32> to vector<8x8xbf16>
    %c0_17 = arith.constant 0 : index
    %c1 = arith.constant 1 : index
    %c0_18 = arith.constant 0 : index
    %c0_19 = arith.constant 0 : index
    %43 = vector.load %arg7[%c0_17, %c1, %c0_18, %c0_19] : memref<1x4x8x8xbf16, #tpu.memory_space<vmem>>, vector<1x1x8x8xbf16>
    %44 = vector.shape_cast %43 : vector<1x1x8x8xbf16> to vector<8x8xbf16>
    %45 = vector.shape_cast %42 : vector<8x8xbf16> to vector<1x1x8x8xbf16>
    tpu.vector_store %arg7[%c0_17, %c1, %c0_18, %c0_19], %45 {strides = array<i32>} : memref<1x4x8x8xbf16, #tpu.memory_space<vmem>>, vector<1x1x8x8xbf16>,
    %cst_20 = arith.constant dense<0.000000e+00> : vector<8x8xf32>
    %46 = tpu.matmul %42, %30, %cst_20 {dimension_numbers = #tpu.dot_dimension_numbers<[1], [0], [0], [1], [0, 0, 1, 1], [], []>} : vector<8x8xbf16>, vector<8x8xbf16>, vector<8x8xf32> -> vector<8x8xf32>
    %47 = arith.truncf %46 : vector<8x8xf32> to vector<8x8xbf16>
    %48 = vector.extract_strided_slice %7 {offsets = [0, 16], sizes = [8, 8], strides = [1, 1]} : vector<8x96xbf16> to vector<8x8xbf16>
    %49 = vector.extract_strided_slice %7 {offsets = [0, 48], sizes = [8, 8], strides = [1, 1]} : vector<8x96xbf16> to vector<8x8xbf16>
    %50 = vector.extract_strided_slice %7 {offsets = [0, 80], sizes = [8, 8], strides = [1, 1]} : vector<8x96xbf16> to vector<8x8xbf16>
    %cst_21 = arith.constant dense<0.000000e+00> : vector<8x8xf32>
    %51 = tpu.matmul %48, %49, %cst_21 {dimension_numbers = #tpu.dot_dimension_numbers<[1], [1], [0], [0], [0, 0, 1, 0], [], []>} : vector<8x8xbf16>, vector<8x8xbf16>, vector<8x8xf32> -> vector<8x8xf32>
    %cst_22 = arith.constant dense<0xFF800000> : vector<8xf32>
    %52 = vector.multi_reduction <maximumf>, %51, %cst_22 [1] : vector<8x8xf32> to vector<8xf32>
    %53 = vector.shape_cast %52 : vector<8xf32> to vector<8x1xf32>
    %54 = vector.broadcast %53 : vector<8x1xf32> to vector<8x8xf32>
    %55 = arith.subf %51, %54 : vector<8x8xf32>
    %56 = math.exp %55 : vector<8x8xf32>
    %cst_23 = arith.constant dense<0.000000e+00> : vector<8xf32>
    %57 = vector.multi_reduction <add>, %56, %cst_23 [1] : vector<8x8xf32> to vector<8xf32>
    %58 = vector.shape_cast %57 : vector<8xf32> to vector<8x1xf32>
    %59 = tpu.reciprocal %58 {approx = true} : vector<8x1xf32> -> vector<8x1xf32>
    %60 = vector.broadcast %59 : vector<8x1xf32> to vector<8x8xf32>
    %61 = arith.mulf %56, %60 : vector<8x8xf32>
    %62 = arith.truncf %61 : vector<8x8xf32> to vector<8x8xbf16>
    %c0_24 = arith.constant 0 : index
    %c2 = arith.constant 2 : index
    %c0_25 = arith.constant 0 : index
    %c0_26 = arith.constant 0 : index
    %63 = vector.load %arg7[%c0_24, %c2, %c0_25, %c0_26] : memref<1x4x8x8xbf16, #tpu.memory_space<vmem>>, vector<1x1x8x8xbf16>
    %64 = vector.shape_cast %63 : vector<1x1x8x8xbf16> to vector<8x8xbf16>
    %65 = vector.shape_cast %62 : vector<8x8xbf16> to vector<1x1x8x8xbf16>
    tpu.vector_store %arg7[%c0_24, %c2, %c0_25, %c0_26], %65 {strides = array<i32>} : memref<1x4x8x8xbf16, #tpu.memory_space<vmem>>, vector<1x1x8x8xbf16>,
    %cst_27 = arith.constant dense<0.000000e+00> : vector<8x8xf32>
    %66 = tpu.matmul %62, %50, %cst_27 {dimension_numbers = #tpu.dot_dimension_numbers<[1], [0], [0], [1], [0, 0, 1, 1], [], []>} : vector<8x8xbf16>, vector<8x8xbf16>, vector<8x8xf32> -> vector<8x8xf32>
    %67 = arith.truncf %66 : vector<8x8xf32> to vector<8x8xbf16>
    %68 = vector.extract_strided_slice %7 {offsets = [0, 24], sizes = [8, 8], strides = [1, 1]} : vector<8x96xbf16> to vector<8x8xbf16>
    %69 = vector.extract_strided_slice %7 {offsets = [0, 56], sizes = [8, 8], strides = [1, 1]} : vector<8x96xbf16> to vector<8x8xbf16>
    %70 = vector.extract_strided_slice %7 {offsets = [0, 88], sizes = [8, 8], strides = [1, 1]} : vector<8x96xbf16> to vector<8x8xbf16>
    %cst_28 = arith.constant dense<0.000000e+00> : vector<8x8xf32>
    %71 = tpu.matmul %68, %69, %cst_28 {dimension_numbers = #tpu.dot_dimension_numbers<[1], [1], [0], [0], [0, 0, 1, 0], [], []>} : vector<8x8xbf16>, vector<8x8xbf16>, vector<8x8xf32> -> vector<8x8xf32>
    %cst_29 = arith.constant dense<0xFF800000> : vector<8xf32>
    %72 = vector.multi_reduction <maximumf>, %71, %cst_29 [1] : vector<8x8xf32> to vector<8xf32>
    %73 = vector.shape_cast %72 : vector<8xf32> to vector<8x1xf32>
    %74 = vector.broadcast %73 : vector<8x1xf32> to vector<8x8xf32>
    %75 = arith.subf %71, %74 : vector<8x8xf32>
    %76 = math.exp %75 : vector<8x8xf32>
    %cst_30 = arith.constant dense<0.000000e+00> : vector<8xf32>
    %77 = vector.multi_reduction <add>, %76, %cst_30 [1] : vector<8x8xf32> to vector<8xf32>
    %78 = vector.shape_cast %77 : vector<8xf32> to vector<8x1xf32>
    %79 = tpu.reciprocal %78 {approx = true} : vector<8x1xf32> -> vector<8x1xf32>
    %80 = vector.broadcast %79 : vector<8x1xf32> to vector<8x8xf32>
    %81 = arith.mulf %76, %80 : vector<8x8xf32>
    %82 = arith.truncf %81 : vector<8x8xf32> to vector<8x8xbf16>
    %c0_31 = arith.constant 0 : index
    %c3 = arith.constant 3 : index
    %c0_32 = arith.constant 0 : index
    %c0_33 = arith.constant 0 : index
    %83 = vector.load %arg7[%c0_31, %c3, %c0_32, %c0_33] : memref<1x4x8x8xbf16, #tpu.memory_space<vmem>>, vector<1x1x8x8xbf16>
    %84 = vector.shape_cast %83 : vector<1x1x8x8xbf16> to vector<8x8xbf16>
    %85 = vector.shape_cast %82 : vector<8x8xbf16> to vector<1x1x8x8xbf16>
    tpu.vector_store %arg7[%c0_31, %c3, %c0_32, %c0_33], %85 {strides = array<i32>} : memref<1x4x8x8xbf16, #tpu.memory_space<vmem>>, vector<1x1x8x8xbf16>,
    %cst_34 = arith.constant dense<0.000000e+00> : vector<8x8xf32>
    %86 = tpu.matmul %82, %70, %cst_34 {dimension_numbers = #tpu.dot_dimension_numbers<[1], [0], [0], [1], [0, 0, 1, 1], [], []>} : vector<8x8xbf16>, vector<8x8xbf16>, vector<8x8xf32> -> vector<8x8xf32>
    %87 = arith.truncf %86 : vector<8x8xf32> to vector<8x8xbf16>
    %88 = tpu.concatenate %27, %47, %67, %87 in 1 : vector<8x8xbf16>, vector<8x8xbf16>, vector<8x8xbf16>, vector<8x8xbf16> -> vector<8x32xbf16>
    %c0_35 = arith.constant 0 : index
    %c0_36 = arith.constant 0 : index
    %89 = vector.load %arg4[%c0_35, %c0_36] : memref<32x32xbf16, #tpu.memory_space<vmem>>, vector<32x32xbf16>
    %cst_37 = arith.constant dense<0.000000e+00> : vector<8x32xf32>
    %90 = tpu.matmul %88, %89, %cst_37 {dimension_numbers = #tpu.dot_dimension_numbers<[1], [0], [0], [1], [0, 0, 1, 1], [], []>} : vector<8x32xbf16>, vector<32x32xbf16>, vector<8x32xf32> -> vector<8x32xf32>
    %c0_38 = arith.constant 0 : index
    %c0_39 = arith.constant 0 : index
    %91 = vector.load %arg5[%c0_38, %c0_39] : memref<1x32xf32, #tpu.memory_space<vmem>>, vector<1x32xf32>
    %92 = vector.broadcast %91 : vector<1x32xf32> to vector<8x32xf32>
    %93 = arith.addf %90, %92 : vector<8x32xf32>
    %c0_40 = arith.constant 0 : index
    %c0_41 = arith.constant 0 : index
    %c0_42 = arith.constant 0 : index
    %94 = vector.load %arg6[%c0_40, %c0_41, %c0_42] : memref<1x8x32xf32, #tpu.memory_space<vmem>>, vector<1x8x32xf32>
    %95 = vector.shape_cast %94 : vector<1x8x32xf32> to vector<8x32xf32>
    %96 = vector.shape_cast %93 : vector<8x32xf32> to vector<1x8x32xf32>
    tpu.vector_store %arg6[%c0_40, %c0_41, %c0_42], %96 {strides = array<i32>} : memref<1x8x32xf32, #tpu.memory_space<vmem>>, vector<1x8x32xf32>,
    return
  }
  func.func @transform_0(%arg0: i32) -> (i32, i32, i32) {
    %c0_i32 = arith.constant 0 : i32
    %c0_i32_0 = arith.constant 0 : i32
    %c0_i32_1 = arith.constant 0 : i32
    return %arg0, %c0_i32, %c0_i32_0 : i32, i32, i32
  }
  func.func @transform_1(%arg0: i32) -> (i32, i32) {
    %c0_i32 = arith.constant 0 : i32
    %c0_i32_0 = arith.constant 0 : i32
    %c0_i32_1 = arith.constant 0 : i32
    return %c0_i32, %c0_i32_0 : i32, i32
  }
  func.func @transform_2(%arg0: i32) -> (i32, i32) {
    %c0_i32 = arith.constant 0 : i32
    %c0_i32_0 = arith.constant 0 : i32
    %c0_i32_1 = arith.constant 0 : i32
    return %c0_i32, %c0_i32_0 : i32, i32
  }
  func.func @transform_3(%arg0: i32) -> (i32, i32) {
    %c0_i32 = arith.constant 0 : i32
    %c0_i32_0 = arith.constant 0 : i32
    %c0_i32_1 = arith.constant 0 : i32
    return %c0_i32, %c0_i32_0 : i32, i32
  }
  func.func @transform_4(%arg0: i32) -> (i32, i32) {
    %c0_i32 = arith.constant 0 : i32
    %c0_i32_0 = arith.constant 0 : i32
    %c0_i32_1 = arith.constant 0 : i32
    return %c0_i32, %c0_i32_0 : i32, i32
  }
  func.func @transform_5(%arg0: i32) -> (i32, i32, i32) {
    %c0_i32 = arith.constant 0 : i32
    %c0_i32_0 = arith.constant 0 : i32
    %c0_i32_1 = arith.constant 0 : i32
    return %arg0, %c0_i32, %c0_i32_0 : i32, i32, i32
  }
  func.func @transform_6(%arg0: i32) -> (i32, i32, i32, i32) {
    %c0_i32 = arith.constant 0 : i32
    %c0_i32_0 = arith.constant 0 : i32
    %c0_i32_1 = arith.constant 0 : i32
    %c0_i32_2 = arith.constant 0 : i32
    return %arg0, %c0_i32, %c0_i32_0, %c0_i32_1 : i32, i32, i32, i32
  }
}

</mosaic_0001>

<bundles_post_ra>
// kernel: tpu_custom_call.1
= control target key start
LH: loop header
LB: loop body
LE: loop exit
PB: predicated region body
PF: predicated region fallthrough
CT: control target
= control target key end

     0   :  { %s1850_s0 = inlined_call_operand.hbm [shape: bf16[2,8,32], index: 0, kind: input, shape index: {}]   ;;  %s1851_s1 = inlined_call_operand.hbm [shape: bf16[32,96], index: 1, kind: input, shape index: {}]   ;;  %s1852_s2 = inlined_call_operand.vmem [shape: f32[1,96], index: 2, kind: input, shape index: {}]   ;;  %s1853_s3 = inlined_call_operand.hbm [shape: bf16[32,32], index: 3, kind: input, shape index: {}]   ;;  %s1854_s4 = inlined_call_operand.vmem [shape: f32[1,32], index: 4, kind: input, shape index: {}]   ;;  %s1855_s5 = inlined_call_operand.hbm [shape: f32[2,8,32], index: 5, kind: output, shape index: {0}]   ;;  %s1856_s6 = inlined_call_operand.hbm [shape: bf16[2,4,8,8], index: 6, kind: output, shape index: {1}]  }
   0x1   :  { %1861 = sst [smem:[#allocation15_spill]] %s1851_s1 }
   0x2   :  { %12 = vsyncpa [#allocation3], 0 }
   0x3   :  { %14 = vsyncpa [#allocation3 + $0x1], 0 }
   0x4   :  { %15 = vsyncpa [#allocation6], 0 }
   0x5   :  { %16 = vsyncpa [#allocation4], 0 }
   0x6   :  { %18 = vsyncpa [#allocation4 + $0x1], 0 }
   0x7   :  { %19 = vsyncpa [#allocation10], 0 }
   0x8   :  { %21 = vsyncpa [#allocation10 + $0x1], 0  ;;  %s1546_s21 = smov 0   ;;  %s1548_s22 = smov 0  }
   0x9   :  { %s1550_s23 = smov 0   ;;  %s1552_s24 = smov 0  }
   0xa LB: > { %s1567_s25 = sadd.s32 4294967295, %s1485_s24   ;;  %s1070_s26 = sadd.s32 4294967294, %s1485_s24   ;;  %s1485_s24 = sphi %s1552_s24, %s1880_s24   ;;  %s1481_s23 = sphi %s1550_s23, %s1879_s23   ;;  %s1477_s22 = sphi %s1548_s22, %s1878_s22   ;;  %s1473_s21 = sphi %s1546_s21, %s1877_s21  }
   0xb   : > { %p47_p0 = scmp.ne.s32.totalorder %s1477_s22, %s1473_s21  ;;  %p1857_p1 = scmp.eq.s32.totalorder %s1567_s25, 0 }
   0xc   : > { %p161_p3 = scmp.eq.s32.totalorder %s1070_s26, 1  ;;  %p1071_p5 = scmp.ge.s32.totalorder %s1485_s24, 1 }
   0xd   : > { %p1576_p4 = por %p1857_p1, %p47_p0  ;;  %p194_p7 = scmp.lt.s32.totalorder %s1485_s24, 3 }
   0xe   : > { %p1581_p6 = por %p161_p3, %p47_p0  ;;  %s1487_s30 = smov [#allocation5]  }
   0xf   : > { %s1862_s27 = scalar_select %p1576_p4, 1, 0 }
  0x10   : > { %s1863_s28 = scalar_select %p1581_p6, 1, 0 }
  0x11   : > { %p1586_p8 = pnand %p1071_p5, %p194_p7  ;;  %s206_s7 = sshll.u32 %s1487_s30, 4  ;;  %s207_s7 = int_to_ptr.vmem [resolvable:$true] %s206_s7 }
  0x12   : > { %s1488_s9 = smov [#allocation7]   ;;  %s1318_s11 = scalar_lea.vmem %s207_s7, 256 }
  0x13   : > { %s1864_s29 = scalar_select %p1586_p8, 1, 0 }
  0x14   : > { %p1210_p9 = pneg %p1586_p8  ;;  %s222_s10 = sshll.u32 %s1488_s9, 4  ;;  %s223_s10 = int_to_ptr.vmem [resolvable:$true] %s222_s10 }
  0x15   : > { %p1319_p13 = scmp.ne.s32.totalorder %s207_s7, %s1318_s11  ;;  %p1326_p5 = scmp.lt.s32.totalorder %s207_s7, %s207_s7 }
  0x16   : > { %p1595_p11 = pnand %p1210_p9, %p1857_p1  ;;  %p1327_p7 = scmp.lt.s32.totalorder %s1318_s11, %s1318_s11 }
  0x18   : > { %p1309_p12 = pneg %p1595_p11  ;;  %p1328_p10 = por %p1327_p7, %p1326_p5 }
  0x1a   : > { %p1321_p0 = pnand %p1319_p13, %p1309_p12 }
  0x1c   : > { %p1322_p3 = pneg %p1321_p0 }
  0x1e   : > { %p1329_p9 = pnand %p1328_p10, %p1322_p3 }
  0x20   : > { %1332 = shalt.err (!%p1329_p9)
}
  0x21   : > { %s1489_s12 = smov 64   ;;  %s1490_s13 = smov 4  }
  0x22   : > { %s1866_s1 = sld [smem:[#allocation15_spill]]  ;;  %s1344_s16 = scalar_lea.vmem %s223_s10, 256 }
  0x23   : > { %p1345_p1 = scmp.ne.s32.totalorder %s223_s10, %s1344_s16  ;;  %p1352_p2 = scmp.lt.s32.totalorder %s223_s10, %s223_s10 }
  0x24   : > { %p1353_p6 = scmp.lt.s32.totalorder %s1344_s16, %s1344_s16 }
  0x25   : > { %p1347_p13 = pnand %p1345_p1, %p1309_p12 }
  0x26   : > { %p1354_p5 = por %p1353_p6, %p1352_p2 }
  0x27   : > { %p1348_p0 = pneg %p1347_p13 }
  0x28   : > { %1213 = dma.hbm_to_vmem [thread:$0]  (!%p1595_p11), %s1866_s1, 256, %s207_s7, [#allocation6], %s1489_s12, %s1489_s12, %s1490_s13  }
  0x29   : > { %p1355_p10 = pnand %p1354_p5, %p1348_p0 }
  0x2b   : > { %1358 = shalt.err (!%p1355_p10)
}
  0x2c   : > { %1216 = dma.hbm_to_vmem [thread:$0]  (!%p1595_p11), %s1853_s3, 256, %s223_s10, [#allocation6], %s1489_s12, %s1489_s12, %s1490_s13  }
  0x2d   : > { %s1618_s19 = sadd.s32 1, %s1485_s24   ;;  %s34_s20 = sadd.s32 1, %s1481_s23 }
  0x2e   : > { %s31_s26 = ssub.s32 %s1485_s24, %s1618_s19  ;;  %p41_p1 = scmp.ne.s32.totalorder %s1481_s23, %s1477_s22 }
  0x2f   : > { %p32_p2 = scmp.eq.s32.totalorder %s31_s26, 0  ;;  %p42_p6 = scmp.eq.s32.totalorder %s1485_s24, 0 }
  0x30   : > { %p1867_p12 = scmp.eq.s32.totalorder %s1567_s25, 1  ;;  %p1230_p7 = scmp.lt.s32.totalorder %s1485_s24, 2 }
  0x31   : > { %s1634_s7 = scalar_select %p32_p2, %s1481_s23, %s34_s20  }
  0x32   : > { %p1628_p3 = por %p1867_p12, %p41_p1  ;;  %p43_p9 = por %p42_p6, %p41_p1 }
  0x33   : > { %s239_s8 = sand.u32 1, %s1481_s23   ;;  %s1076_s10 = sshll.u32 %s1485_s24, 6 }
  0x34   : > { %s1868_s30 = scalar_select %p1628_p3, 1, 0 }
  0x35   : > { %s1075_s9 = sshll.u32 %s239_s8, 2  ;;  %s1641_s13 = scalar_lea.hbm %s1850_s0, %s1076_s10 }
  0x36   : > { %s243_s14 = scalar_lea.vmem [#allocation2], %s1075_s9  ;;  %p1643_p11 = pnand %p1230_p7, %p43_p9 }
  0x37   : > { %s250_s15 = sshll.u32 %s243_s14, 4  ;;  %s240_s17 = scalar_lea.sflag [#allocation3], %s239_s8  ;;  %s251_s15 = int_to_ptr.vmem [resolvable:$true] %s250_s15 }
  0x38   : > { %s1359_s18 = scalar_lea.hbm %s1641_s13, 64  ;;  %p1361_p0 = pneg %p1643_p11 }
  0x39   : > { %p1360_p13 = scmp.ne.s32.totalorder %s1641_s13, %s1359_s18  ;;  %s1364_s10 = scalar_lea.hbm %s1850_s0, 128 }
  0x3a   : > { %p1365_p1 = scmp.lt.s32.totalorder %s1641_s13, %s1850_s0  ;;  %p1366_p2 = scmp.lt.s32.totalorder %s1364_s10, %s1359_s18 }
  0x3b   : > { %p1362_p5 = pnand %p1361_p0, %p1360_p13 }
  0x3c   : > { %p1367_p6 = por %p1366_p2, %p1365_p1 }
  0x3d   : > { %p1363_p10 = pneg %p1362_p5 }
  0x3f   : > { %p1368_p12 = pnand %p1367_p6, %p1363_p10 }
  0x41   : > { %1371 = shalt.err (!%p1368_p12)
}
  0x42   : > { %s1372_s12 = scalar_lea.vmem %s251_s15, 64  ;;  %s1491_s8 = smov [#allocation2]  }
  0x43   : > { %p1373_p7 = scmp.ne.s32.totalorder %s251_s15, %s1372_s12  ;;  %s1377_s14 = sshll.u32 %s1491_s8, 4  ;;  %s1378_s14 = int_to_ptr.vmem [resolvable:$false] %s1377_s14 }
  0x44   : > { %s1379_s1 = scalar_lea.vmem %s1378_s14, 128  ;;  %p1380_p13 = scmp.lt.s32.totalorder %s251_s15, %s1378_s14 }
  0x45   : > { %p1375_p9 = pnand %p1373_p7, %p1361_p0  ;;  %p1381_p5 = scmp.lt.s32.totalorder %s1379_s1, %s1372_s12 }
  0x47   : > { %p1376_p3 = pneg %p1375_p9  ;;  %p1382_p4 = por %p1381_p5, %p1380_p13 }
  0x49   : > { %p1383_p8 = pnand %p1382_p4, %p1376_p3 }
  0x4b   : > { %1386 = shalt.err (!%p1383_p8)
}
  0x4c   : > { %1220 = dma.hbm_to_vmem [thread:$0]  (!%p1643_p11), %s1641_s13, 64, %s251_s15, %s240_s17  }
  0x4d   : > { %p1870_p10 = scmp.ne.s32.totalorder %s1864_s29, 0 }
  0x4e   : > { %s1664_s18 = sand.u32 (!%p1870_p10), 1, %s1477_s22   ;;  %p1871_p0 = scmp.ne.s32.totalorder (!%p1870_p10), %s1862_s27, 0 }
  0x4f   : > { %259 = sbr.rel (%p1870_p10) target bundleno = 1506 (0x5e2), region = 40  ;;  %s1078_s20 = sshll.u32 (!%p1870_p10), %s1664_s18, 2 }
  0x50   : > { %s262_s26 = scalar_lea.sflag (!%p1870_p10), [#allocation3], %s1664_s18  ;;  %s265_s10 = scalar_lea.vmem (!%p1870_p10), [#allocation2], %s1078_s20 }
  0x54   : > { %1456 = dma.done.wait (%p1871_p0), %s262_s26, 64  }
  0x55   : > { %1458 = vsyncadd (%p1871_p0), %s262_s26, 4294967232  ;;  %p1872_p4 = scmp.eq.s32.totalorder %s1567_s25, 0 }
  0x57   : > { %1460 = dma.done.wait (%p1872_p4), [#allocation6], 512   ;;  %p1873_p8 = pmov %p1872_p4 }
  0x58   : > { %v1492_v0 = vmov 0.0   ;;  %vm1493_vm0 = vmmov 0   ;;  %v1287_v1 = vld [vmem:[#allocation5 + $0x8] sm:$0xff]   ;;  %v1288_v2 = vld [vmem:[#allocation5] sm:$0xff]   ;;  %v308_v3 = vld [vmem:[%s265_s10] sm:$0xf] }
  0x59   : > { %1462 = vsyncadd (%p1873_p8), [#allocation6], 4294966784  ;;  %1132 = vmatprep.subr.bf16.mxu0 %v1492_v0  ;;  %1136 = vmatprep.mubr.msk.bf16.mxu0 %vm1493_vm0, %v1492_v0  ;;  %vm332_vm1 = vcmask 261120   ;;  %v1083_v4 = vld [vmem:[%s1852_s2] ss:$0 sm:$0xff]  ;;  %s1494_s29 = smov 120  }
  0x5a   : > { %1140 = vmatprep.subr.bf16.mxu1 %v1492_v0  ;;  %1142 = vmatprep.mubr.msk.bf16.mxu1 %vm1493_vm0, %v1492_v0  ;;  %s1495_s13 = smov 96   ;;  %s1496_s15 = smov 80   ;;  %vm380_vm2 = vcmask 64512   ;;  %vm439_vm3 = vcmask 60416   ;;  %vm446_vm4 = vcmask 1043456   ;;  %vm842_vm5 = vcmask 130048  }
  0x5b   : > { %1133 = vmatpush3.bf16.msra.mxu0 %v1287_v1  ;;  %s1497_s16 = smov 88   ;;  %s1498_s17 = smov 72   ;;  %vm845_vm6 = vcmask 195584  }
  0x5c   : > { %1134 = vmatprep.subr.bf16.mxu0 %v1492_v0  ;;  %s1499_s11 = smov 112   ;;  %s1500_s9 = smov 104  }
  0x5d   : > { %s1501_s12 = smov 56   ;;  %s1502_s8 = smov 64  }
  0x5e   : > { %s1503_s14 = smov 40   ;;  %s1504_s20 = smov 48  }
  0x5f   : > { %1135 = vmatpush3.bf16.msra.mxu0 %v1288_v2  ;;  %s1082_s26 = sshll.u32 %s1664_s18, 4  ;;  %s1505_s1 = smov 8  }
  0x60   : > { %1146 = vmatprep.subr.bf16.mxu0 %v1492_v0  ;;  %s1734_s10 = scalar_lea.vmem [#allocation9], %s1082_s26  ;;  %s1506_s27 = smov 16  }
  0x61   : > { %p1874_p11 = scmp.ne.s32.totalorder %s1868_s30, 0 }
  0x62   : > { %1137 = vmatmul.mubr.msk.bf16.vlgmr.msra.gmra.mxu0 %vm332_vm1, %v308_v3 }
  0x63   : > { %1148 = vmatprep.mubr.msk.bf16.mxu0 %vm1493_vm0, %v1492_v0 }
 0x122   : > { %v370_v5 = vpop.f32.mrf.mxu0 }
 0x123   : > { %v371_v6 = vadd.f32 %v1083_v4, %v370_v5 }
 0x124   : > { %v1138_v7 = vpop.f32.mrf.mxu0 }
 0x125   : > { %v1690_v8 = vpack.c.bf16 %v371_v6, %v371_v6 }
 0x126   : > { %v373_v9 = vpop.f32.mrf.mxu0 }
 0x127   : > { %491 = vrot.lane.b32.xlu1 %v1690_v8, %s1494_s29  ;;  %378 = vrot.lane.b32.xlu0 %v1690_v8, %s1495_s13  ;;  %s1507_s29 = smov 24   ;;  %s1109_s13 = sshll.u32 %s1567_s25, 8 }
 0x128   : > { %v1139_v10 = vpop.f32.mrf.mxu0 }
 0x12b   : > { %606 = vrot.lane.b32.xlu1 %v1690_v8, %s1496_s15  ;;  %493 = vrot.lane.b32.xlu0 %v1690_v8, %s1497_s16  ;;  %s946_s15 = sshll.u32 %s1734_s10, 4  ;;  %s1771_s15 = int_to_ptr.vmem [resolvable:$true] %s946_s15 }
 0x12f   : > { %719 = vrot.lane.b32.xlu1 %v1690_v8, %s1498_s17  ;;  %604 = vrot.lane.b32.xlu0 %v1690_v8, %s1499_s11  ;;  %s1769_s11 = scalar_lea.hbm %s1856_s6, %s1109_s13 }
 0x133   : > { %717 = vrot.lane.b32.xlu0 %v1690_v8, %s1500_s9  ;;  %s920_s9 = scalar_lea.sflag [#allocation10], %s1664_s18 }
 0x199   : > { %v379_v11 = vpop.permute.xlu0 %378  ;;  %v492_v14 = vpop.permute.xlu1 %491 }
 0x19a   : > { %v385_v12 = vsel %vm380_vm2, %v379_v11, 0 }
 0x19b   : > { %1141 = vmatpush3.bf16.xpose.msra.mxu1 %v385_v12 }
 0x19c   : > { %1152 = vmatprep.subr.bf16.mxu1 %v1492_v0 }
 0x19d   : > { %v494_v13 = vpop.permute.xlu0 %493  ;;  %v607_v16 = vpop.permute.xlu1 %606 }
 0x19e   : > { %v499_v15 = vsel %vm380_vm2, %v494_v13, 0  ;;  %v612_v17 = vsel %vm380_vm2, %v607_v16, 0 }
 0x1a1   : > { %v720_v18 = vpop.permute.xlu1 %719  ;;  %v605_v19 = vpop.permute.xlu0 %604 }
 0x1a2   : > { %1143 = vmatmul.mubr.msk.bf16.vlgmr.msra.gmra.mxu1 %vm380_vm2, %v1690_v8  ;;  %v725_v20 = vsel %vm380_vm2, %v720_v18, 0 }
 0x1a3   : > { %1153 = vmatpush3.bf16.xpose.msra.mxu1 %v499_v15  ;;  %1154 = vmatprep.mubr.msk.bf16.mxu1 %vm1493_vm0, %v1492_v0 }
 0x1a4   : > { %1164 = vmatprep.subr.bf16.mxu1 %v1492_v0 }
 0x1a5   : > { %v718_v21 = vpop.permute.xlu0 %717 }
 0x1aa   : > { %1155 = vmatmul.mubr.msk.bf16.vlgmr.msra.gmra.mxu1 %vm380_vm2, %v492_v14 }
 0x1ab   : > { %1165 = vmatpush3.bf16.xpose.msra.mxu1 %v612_v17  ;;  %1166 = vmatprep.mubr.msk.bf16.mxu1 %vm1493_vm0, %v1492_v0 }
 0x1ac   : > { %1176 = vmatprep.subr.bf16.mxu1 %v1492_v0 }
 0x1b2   : > { %1167 = vmatmul.mubr.msk.bf16.vlgmr.msra.gmra.mxu1 %vm380_vm2, %v605_v19 }
 0x1b3   : > { %1177 = vmatpush3.bf16.xpose.msra.mxu1 %v725_v20  ;;  %1178 = vmatprep.mubr.msk.bf16.mxu1 %vm1493_vm0, %v1492_v0 }
 0x1b4   : > { %1188 = vmatprep.subr.bf16.mxu1 %v1492_v0 }
 0x1ba   : > { %1179 = vmatmul.mubr.msk.bf16.vlgmr.msra.gmra.mxu1 %vm380_vm2, %v718_v21 }
 0x1bb   : > { %1192 = vmatprep.mubr.msk.bf16.mxu1 %vm1493_vm0, %v1492_v0 }
 0x262   : > { %v421_v22 = vpop.f32.mrf.mxu1 }
 0x263   : > { %v427_v23 = vsel %vm380_vm2, %v421_v22, -inf }
 0x264   : > { %428 = vmax.xlane.f32.xlu1 %v427_v23  ;;  %v1144_v24 = vpop.f32.mrf.mxu1 }
 0x266   : > { %v424_v25 = vpop.f32.mrf.mxu1 }
 0x268   : > { %v1145_v26 = vpop.f32.mrf.mxu1 }
 0x26a   : > { %v535_v27 = vpop.f32.mrf.mxu1 }
 0x26b   : > { %v541_v28 = vsel %vm380_vm2, %v535_v27, -inf }
 0x26c   : > { %542 = vmax.xlane.f32.xlu0 %v541_v28  ;;  %v1156_v29 = vpop.f32.mrf.mxu1 }
 0x26e   : > { %v538_v30 = vpop.f32.mrf.mxu1 }
 0x270   : > { %v1157_v31 = vpop.f32.mrf.mxu1 }
 0x272   : > { %v648_v32 = vpop.f32.mrf.mxu1 }
 0x273   : > { %v654_v33 = vsel %vm380_vm2, %v648_v32, -inf }
 0x274   : > { %655 = vmax.xlane.f32.xlu0 %v654_v33  ;;  %v1168_v34 = vpop.f32.mrf.mxu1  ;;  %v1290_v33 = vld [vmem:[#allocation7] sm:$0xff]  }
 0x276   : > { %v651_v35 = vpop.f32.mrf.mxu1 }
 0x278   : > { %v1169_v36 = vpop.f32.mrf.mxu1 }
 0x27a   : > { %v761_v37 = vpop.f32.mrf.mxu1 }
 0x27b   : > { %v767_v38 = vsel %vm380_vm2, %v761_v37, -inf }
 0x27c   : > { %768 = vmax.xlane.f32.xlu1 %v767_v38  ;;  %v1180_v39 = vpop.f32.mrf.mxu1 }
 0x27e   : > { %v764_v40 = vpop.f32.mrf.mxu1 }
 0x280   : > { %v1181_v41 = vpop.f32.mrf.mxu1 }
 0x2ed   : > { %v429_v42 = vpop.xlane.xlu1 %428 }
 0x2ee   : > { %v430_v43 = vsub.f32 %v421_v22, %v429_v42 }
 0x2f0   : > { %v431_v44 = vmul.f32 1.442695, %v430_v43 }
 0x2f2   : > { %1291 = vpow2.f32 %v431_v44 }
 0x2f5   : > { %v543_v45 = vpop.xlane.xlu0 %542 }
 0x2f6   : > { %v544_v46 = vsub.f32 %v535_v27, %v543_v45 }
 0x2f8   : > { %v545_v47 = vmul.f32 1.442695, %v544_v46 }
 0x2fa   : > { %1293 = vpow2.f32 %v545_v47 }
 0x2fd   : > { %v656_v48 = vpop.xlane.xlu0 %655 }
 0x2fe   : > { %v657_v49 = vsub.f32 %v648_v32, %v656_v48  ;;  %v1289_v32 = vld [vmem:[#allocation7 + $0x8] sm:$0xff]  }
 0x2ff   : > { %v1292_v50 = vpop.eup %1291  ;;  %1189 = vmatpush3.bf16.msra.mxu1 %v1289_v32 }
 0x300   : > { %v658_v51 = vmul.f32 1.442695, %v657_v49  ;;  %v433_v52 = vsel %vm380_vm2, %v1292_v50, 0.0  ;;  %1190 = vmatprep.subr.bf16.mxu1 %v1492_v0 }
 0x301   : > { %434 = vadd.xlane.f32.xlu0 %v433_v52 }
 0x302   : > { %1295 = vpow2.f32 %v658_v51 }
 0x303   : > { %1191 = vmatpush3.bf16.msra.mxu1 %v1290_v33 }
 0x305   : > { %v769_v57 = vpop.xlane.xlu1 %768 }
 0x306   : > { %v770_v58 = vsub.f32 %v761_v37, %v769_v57 }
 0x307   : > { %v1294_v53 = vpop.eup %1293 }
 0x308   : > { %v547_v54 = vsel %vm380_vm2, %v1294_v53, 0.0  ;;  %v771_v59 = vmul.f32 1.442695, %v770_v58 }
 0x309   : > { %548 = vadd.xlane.f32.xlu1 %v547_v54 }
 0x30a   : > { %1297 = vpow2.f32 %v771_v59 }
 0x30f   : > { %v1296_v55 = vpop.eup %1295 }
 0x310   : > { %v660_v56 = vsel %vm380_vm2, %v1296_v55, 0.0 }
 0x311   : > { %661 = vadd.xlane.f32.xlu0 %v660_v56 }
 0x317   : > { %v1298_v60 = vpop.eup %1297 }
 0x318   : > { %v773_v61 = vsel %vm380_vm2, %v1298_v60, 0.0 }
 0x31a   : > { %555 = vrot.lane.b32.xlu1 %v1690_v8, %s1501_s12  ;;  %s1387_s12 = scalar_lea.vmem %s1771_s15, 256 }
 0x31b   : > { %p1388_p3 = scmp.ne.s32.totalorder %s1771_s15, %s1387_s12 }
 0x31d   : > { %p1389_p1 = pnand %p1388_p3, %p1874_p11 }
 0x31f   : > { %p1390_p2 = pneg %p1389_p1 }
 0x327   : > { %441 = vrot.lane.b32.xlu0 %v1690_v8, %s1502_s8 }
 0x32b   : > { %781 = vrot.lane.b32.xlu0 %v1690_v8, %s1503_s14  ;;  %s1508_s14 = smov [#allocation9]  }
 0x33e   : > { %774 = vadd.xlane.f32.xlu1 %v773_v61 }
 0x34f   : > { %668 = vrot.lane.b32.xlu1 %v1690_v8, %s1504_s20  ;;  %s1391_s20 = sshll.u32 %s1508_s14, 4  ;;  %s1392_s20 = int_to_ptr.vmem [resolvable:$false] %s1391_s20 }
 0x350   : > { %s1393_s26 = scalar_lea.vmem %s1392_s20, 512  ;;  %p1394_p6 = scmp.lt.s32.totalorder %s1771_s15, %s1392_s20 }
 0x351   : > { %p1395_p12 = scmp.lt.s32.totalorder %s1393_s26, %s1387_s12 }
 0x353   : > { %p1396_p7 = por %p1395_p12, %p1394_p6 }
 0x355   : > { %p1397_p9 = pnand %p1396_p7, %p1390_p2 }
 0x38a   : > { %v435_v62 = vpop.xlane.xlu0 %434 }
 0x38b   : > { %1299 = vrcp.f32 %v435_v62 }
 0x392   : > { %v549_v63 = vpop.xlane.xlu1 %548 }
 0x393   : > { %1301 = vrcp.f32 %v549_v63 }
 0x396   : > { %v556_v8 = vpop.permute.xlu1 %555 }
 0x397   : > { %v561_v10 = vsel %vm446_vm4, %v556_v8, 0 }
 0x398   : > { %v1300_v1 = vpop.eup %1299 }
 0x399   : > { %v437_v2 = vmul.f32 %v1300_v1, %v1292_v50 }
 0x39a   : > { %v662_v3 = vpop.xlane.xlu0 %661 }
 0x39b   : > { %1303 = vrcp.f32 %v662_v3  ;;  %v438_v4 = vpack.c.bf16 %v437_v2, %v437_v2 }
 0x39d   : > { %440 = vst.msk [vmem:[%s1734_s10] sm:$0xf] %vm439_vm3, %v438_v4 }
 0x39e   : > { %v442_v5 = vpop.permute.xlu0 %441 }
 0x39f   : > { %v448_v6 = vsel %vm446_vm4, %v442_v5, 0 }
 0x3a0   : > { %v1302_v7 = vpop.eup %1301  ;;  %1147 = vmatpush3.bf16.msra.mxu0 %v448_v6 }
 0x3a1   : > { %1158 = vmatprep.subr.bf16.mxu0 %v1492_v0  ;;  %v551_v9 = vmul.f32 %v1302_v7, %v1294_v53 }
 0x3a2   : > { %v782_v18 = vpop.permute.xlu0 %781 }
 0x3a3   : > { %1149 = vmatmul.mubr.msk.bf16.vlgmr.msra.gmra.mxu0 %vm380_vm2, %v438_v4  ;;  %v552_v11 = vpack.c.bf16 %v551_v9, %v551_v9  ;;  %v787_v19 = vsel %vm446_vm4, %v782_v18, 0 }
 0x3a4   : > { %1159 = vmatpush3.bf16.msra.mxu0 %v561_v10  ;;  %1160 = vmatprep.mubr.msk.bf16.mxu0 %vm1493_vm0, %v1492_v0 }
 0x3a5   : > { %1090 = vst.msk [vmem:[%s1734_s10 + $0x4] sm:$0xf] %vm439_vm3, %v552_v11  ;;  %1170 = vmatprep.subr.bf16.mxu0 %v1492_v0 }
 0x3a8   : > { %v1304_v12 = vpop.eup %1303 }
 0x3a9   : > { %v664_v13 = vmul.f32 %v1304_v12, %v1296_v55 }
 0x3ab   : > { %1161 = vmatmul.mubr.msk.bf16.vlgmr.msra.gmra.mxu0 %vm380_vm2, %v552_v11  ;;  %v665_v14 = vpack.c.bf16 %v664_v13, %v664_v13 }
 0x3ac   : > { %1172 = vmatprep.mubr.msk.bf16.mxu0 %vm1493_vm0, %v1492_v0 }
 0x3ad   : > { %1093 = vst.msk [vmem:[%s1734_s10 + $0x8] sm:$0xf] %vm439_vm3, %v665_v14 }
 0x3c7   : > { %v775_v15 = vpop.xlane.xlu1 %774 }
 0x3c8   : > { %1305 = vrcp.f32 %v775_v15 }
 0x3cb   : > { %v669_v16 = vpop.permute.xlu1 %668 }
 0x3cc   : > { %v674_v17 = vsel %vm446_vm4, %v669_v16, 0 }
 0x3cd   : > { %1171 = vmatpush3.bf16.msra.mxu0 %v674_v17 }
 0x3ce   : > { %1182 = vmatprep.subr.bf16.mxu0 %v1492_v0 }
 0x3d0   : > { %1173 = vmatmul.mubr.msk.bf16.vlgmr.msra.gmra.mxu0 %vm380_vm2, %v665_v14 }
 0x3d1   : > { %1183 = vmatpush3.bf16.msra.mxu0 %v787_v19  ;;  %1184 = vmatprep.mubr.msk.bf16.mxu0 %vm1493_vm0, %v1492_v0 }
 0x3d5   : > { %v1306_v20 = vpop.eup %1305 }
 0x3d6   : > { %v777_v21 = vmul.f32 %v1306_v20, %v1298_v60 }
 0x3d8   : > { %v778_v22 = vpack.c.bf16 %v777_v21, %v777_v21 }
 0x3da   : > { %1096 = vst.msk [vmem:[%s1734_s10 + $0xc] sm:$0xf] %vm439_vm3, %v778_v22  ;;  %1185 = vmatmul.mubr.msk.bf16.vlgmr.msra.gmra.mxu0 %vm380_vm2, %v778_v22 }
 0x463   : > { %v484_v23 = vpop.f32.mrf.mxu0 }
 0x464   : > { %v490_v0 = vpack.c.bf16 %v484_v23, %v484_v23 }
 0x465   : > { %v1150_v24 = vpop.f32.mrf.mxu0 }
 0x467   : > { %v487_v25 = vpop.f32.mrf.mxu0 }
 0x469   : > { %v1151_v26 = vpop.f32.mrf.mxu0 }
 0x46b   : > { %v597_v27 = vpop.f32.mrf.mxu0 }
 0x46c   : > { %v603_v28 = vpack.c.bf16 %v597_v27, %v597_v27 }
 0x46d   : > { %v1162_v29 = vpop.f32.mrf.mxu0 }
 0x46e   : > { %831 = vrot.lane.b32.xlu1 %v603_v28, %s1505_s1 }
 0x46f   : > { %v600_v30 = vpop.f32.mrf.mxu0 }
 0x471   : > { %v1163_v31 = vpop.f32.mrf.mxu0 }
 0x490   : > { %v710_v34 = vpop.f32.mrf.mxu0 }
 0x491   : > { %v716_v35 = vpack.c.bf16 %v710_v34, %v710_v34 }
 0x492   : > { %v1174_v36 = vpop.f32.mrf.mxu0 }
 0x493   : > { %834 = vrot.lane.b32.xlu0 %v716_v35, %s1506_s27 }
 0x494   : > { %v713_v37 = vpop.f32.mrf.mxu0 }
 0x496   : > { %v1175_v38 = vpop.f32.mrf.mxu0 }
 0x49a   : > { %v823_v39 = vpop.f32.mrf.mxu0 }
 0x49b   : > { %v829_v40 = vpack.c.bf16 %v823_v39, %v823_v39 }
 0x49c   : > { %v1186_v41 = vpop.f32.mrf.mxu0 }
 0x49d   : > { %837 = vrot.lane.b32.xlu1 %v829_v40, %s1507_s29 }
 0x49e   : > { %v826_v42 = vpop.f32.mrf.mxu0 }
 0x4a0   : > { %v1187_v43 = vpop.f32.mrf.mxu0 }
 0x4e0   : > { %v832_v44 = vpop.permute.xlu1 %831 }
 0x4e1   : > { %v841_v46 = vsel %vm380_vm2, %v490_v0, %v832_v44 }
 0x505   : > { %v835_v45 = vpop.permute.xlu0 %834 }
 0x506   : > { %v844_v47 = vsel %vm842_vm5, %v841_v46, %v835_v45 }
 0x50f   : > { %v838_v48 = vpop.permute.xlu1 %837 }
 0x510   : > { %v847_v49 = vsel %vm845_vm6, %v844_v47, %v838_v48 }
 0x511   : > { %1193 = vmatmul.mubr.msk.bf16.vlgmr.msra.gmra.mxu1 %vm332_vm1, %v847_v49 }
 0x512   : > { %1400 = shalt.err (!%p1397_p9)
}
 0x513   : > { %s1401_s10 = scalar_lea.hbm %s1769_s11, 256  ;;  %s1405_s29 = scalar_lea.hbm %s1856_s6, 512 }
 0x514   : > { %p1402_p13 = scmp.ne.s32.totalorder %s1769_s11, %s1401_s10  ;;  %p1406_p0 = scmp.lt.s32.totalorder %s1769_s11, %s1856_s6 }
 0x515   : > { %p1407_p4 = scmp.lt.s32.totalorder %s1405_s29, %s1401_s10 }
 0x516   : > { %p1403_p5 = pnand %p1402_p13, %p1874_p11 }
 0x517   : > { %p1408_p8 = por %p1407_p4, %p1406_p0 }
 0x518   : > { %p1404_p10 = pneg %p1403_p5 }
 0x51a   : > { %p1409_p3 = pnand %p1408_p8, %p1404_p10 }
 0x51c   : > { %1412 = shalt.err (!%p1409_p3)
}
 0x51d   : > { %s1509_s17 = smov 4   ;;  %s1081_s12 = sshll.u32 %s1664_s18, 3  ;;  %v1098_v50 = vld [vmem:[%s1854_s4] ss:$0 sm:$0xff] }
 0x51e   : > { %1207 = dma.vmem_to_hbm [thread:$0]  (%p1874_p11), %s1771_s15, 256, %s1769_s11, %s920_s9, %s1502_s8, %s1502_s8, %s1509_s17  }
 0x51f   : > { %s1104_s26 = sshll.u32 %s1567_s25, 7  ;;  %s299_s10 = scalar_lea.vmem [#allocation8], %s1081_s12 }
 0x520   : > { %s933_s1 = sshll.u32 %s299_s10, 4  ;;  %s1806_s13 = scalar_lea.hbm %s1855_s5, %s1104_s26  ;;  %s1808_s1 = int_to_ptr.vmem [resolvable:$true] %s933_s1 }
 0x521   : > { %s915_s8 = scalar_lea.sflag [#allocation4], %s1664_s18  ;;  %s1413_s25 = scalar_lea.vmem %s1808_s1, 128 }
 0x522   : > { %p1414_p1 = scmp.ne.s32.totalorder %s1808_s1, %s1413_s25  ;;  %s1510_s15 = smov [#allocation8]  }
 0x523   : > { %s1417_s11 = sshll.u32 %s1510_s15, 4  ;;  %s1418_s11 = int_to_ptr.vmem [resolvable:$false] %s1417_s11 }
 0x524   : > { %p1415_p2 = pnand %p1414_p1, %p1874_p11  ;;  %s1419_s9 = scalar_lea.vmem %s1418_s11, 256 }
 0x525   : > { %p1420_p12 = scmp.lt.s32.totalorder %s1808_s1, %s1418_s11  ;;  %p1421_p7 = scmp.lt.s32.totalorder %s1419_s9, %s1413_s25 }
 0x526   : > { %p1416_p6 = pneg %p1415_p2 }
 0x527   : > { %p1422_p9 = por %p1421_p7, %p1420_p12 }
 0x529   : > { %p1423_p13 = pnand %p1422_p9, %p1416_p6 }
 0x5d1   : > { %v907_v51 = vpop.f32.mrf.mxu1 }
 0x5d2   : > { %v908_v52 = vadd.f32 %v1098_v50, %v907_v51 }
 0x5d3   : > { %v1194_v53 = vpop.f32.mrf.mxu1 }
 0x5d4   : > { %913 = vst.msk [vmem:[%s299_s10] sm:$0xff] %vm332_vm1, %v908_v52 }
 0x5d5   : > { %v910_v54 = vpop.f32.mrf.mxu1 }
 0x5d6   : > { %1426 = shalt.err (!%p1423_p13)
}
 0x5d7   : > { %s1427_s16 = scalar_lea.hbm %s1806_s13, 128  ;;  %s1431_s12 = scalar_lea.hbm %s1855_s5, 256 }
 0x5d8   : > { %p1428_p5 = scmp.ne.s32.totalorder %s1806_s13, %s1427_s16  ;;  %p1432_p4 = scmp.lt.s32.totalorder %s1806_s13, %s1855_s5 }
 0x5d9   : > { %p1433_p8 = scmp.lt.s32.totalorder %s1431_s12, %s1427_s16 }
 0x5da   : > { %p1429_p10 = pnand %p1428_p5, %p1874_p11 }
 0x5db   : > { %p1434_p3 = por %p1433_p8, %p1432_p4 }
 0x5dc   : > { %p1430_p0 = pneg %p1429_p10 }
 0x5de   : > { %p1435_p1 = pnand %p1434_p3, %p1430_p0 }
 0x5e0   : > { %1438 = shalt.err (!%p1435_p1)
}
 0x5e1   : > { %1206 = dma.vmem_to_hbm [thread:$0]  (%p1874_p11), %s1808_s1, 128, %s1806_s13, %s915_s8   ;;  %v1195_v55 = vpop.f32.mrf.mxu1 }
 0x5e2 PF: > { %s961_s26 = sand.u32 1, %s1473_s21   ;;  %p1875_p2 = scmp.ne.s32.totalorder %s1863_s28, 0 }
 0x5e3   : > { %p1876_p6 = scmp.ge.s32.totalorder %s1485_s24, 2  ;;  %s962_s10 = scalar_lea.sflag [#allocation4], %s961_s26 }
 0x5e5   : > { %p1222_p12 = pnand %p1876_p6, %p1875_p2 }
 0x5e7   : > { %p1223_p7 = pneg %p1222_p12 }
 0x5e9   : > { %1464 = dma.done.wait (%p1223_p7), %s962_s10, 128  }
 0x5ea   : > { %1466 = vsyncadd (%p1223_p7), %s962_s10, 4294967168  ;;  %s971_s27 = scalar_lea.sflag [#allocation10], %s961_s26 }
 0x5eb   : > { %1468 = dma.done.wait (%p1223_p7), %s971_s27, 256  }
 0x5ec   : > { %1470 = vsyncadd (%p1223_p7), %s971_s27, 4294967040  ;;  %p24_p11 = scmp.ge.s32.totalorder %s1618_s19, 4   ;;  %s1877_s21 = smov %s1477_s22 }
 0x5ed   : > { %s1878_s22 = smov %s1481_s23  ;;  %s1879_s23 = smov %s1634_s7 }
 0x5ee   : > { %s1880_s24 = smov %s1618_s19  ;;  %26 = sbr.rel (!%p24_p11) target bundleno = 10 (0xa), region = 113 }
 0x5f3   :  { %976 = vsyncpa [#allocation3], 1 }
 0x5f4   :  { %978 = vsyncpa [#allocation3 + $0x1], 1 }
 0x5f5   :  { %979 = vsyncpa [#allocation6], 1 }
 0x5f6   :  { %980 = vsyncpa [#allocation4], 1 }
 0x5f7   :  { %982 = vsyncpa [#allocation4 + $0x1], 1 }
 0x5f8   :  { %983 = vsyncpa [#allocation10], 1 }
 0x5f9   :  { %985 = vsyncpa [#allocation10 + $0x1], 1 }

</bundles_post_ra>
